<compile_context>
chip_gen: v6e
topology: v6e:2x2x1
jax: 0.10.0
libtpu: 0.0.40
codegen_flags: <defaults>
</compile_context>

<pallas_src>
import functools

import jax
import jax.numpy as jnp
from jax.experimental import pallas as pl
from jax.experimental.pallas import tpu as pltpu


def _round_up(x, m):
    return (x + m - 1) // m * m


def _bce_logits_kernel(pred_ref, targ_ref, w_ref, out_ref, acc_ref, *,
                       pos_weight, lane_tile, valid_lanes):
    j = pl.program_id(1)

    @pl.when(j == 0)
    def _():
        acc_ref[...] = jnp.zeros_like(acc_ref)

    x = pred_ref[...].astype(jnp.float32)          # (TR, TM) logits
    y = targ_ref[...].astype(jnp.float32)          # (TR, TM) targets

    # PyTorch-stable BCEWithLogits with per-element pos_weight
    #   pe = y * (pw - 1) + 1:
    #   loss = (1 - y) * x + (1 + (pe - 1) * y) * log(1 + exp(-x))
    # with the pos_weight algebra folded: coeff = 1 + (pw - 1) * y * y.
    coeff = 1.0 + (pos_weight - 1.0) * y * y
    softplus_neg_x = jnp.log1p(jnp.exp(-jnp.abs(x))) + jnp.maximum(-x, 0.0)
    loss = (1.0 - y) * x + coeff * softplus_neg_x

    weighted = loss * w_ref[...]                   # (TR, 1) channel weight

    if valid_lanes is not None:                    # static: only if lane-padded
        col = j * lane_tile + jax.lax.broadcasted_iota(jnp.int32, x.shape, 1)
        weighted = jnp.where(col < valid_lanes, weighted, 0.0)

    acc_ref[...] += weighted                       # lane-wise adds only

    @pl.when(j == pl.num_programs(1) - 1)
    def _():
        tr, tm = acc_ref.shape
        # Sublane-tile-aligned leading-dim split (free) + elementwise fold down
        # to one lane-dense (8, TM) partial per row-block; stored once.
        out_ref[...] = jnp.sum(acc_ref[...].reshape(tr // 8, 8, tm), axis=0)


def bce_with_logistic_loss(predict, target, weight, pos_weight,
                           *, row_tile=256, lane_tile=1024):
    assert predict.shape == target.shape, "predict & target shape do not match"
    N, C, H, W = predict.shape
    assert weight.shape[0] == C, (
        "Expect weight shape [{}], get[{}]".format(C, weight.shape[0]))
    R, M = N * C, H * W

    # Zero-copy contiguous views; NO transpose, NO wrapper-side upcast.
    pred2 = predict.reshape(R, M)
    targ2 = target.reshape(R, M)

    tr = min(_round_up(R, 8), row_tile)
    tm = min(_round_up(M, 128), lane_tile)
    r_pad = _round_up(R, tr)
    m_pad = _round_up(M, tm)
    if r_pad != R or m_pad != M:                   # only pad when required
        pred2 = jnp.pad(pred2, ((0, r_pad - R), (0, m_pad - M)))
        targ2 = jnp.pad(targ2, ((0, r_pad - R), (0, m_pad - M)))

    # Per-row channel weight: row r = n*C + c -> weight[c]; padded rows get 0.
    w_rows = jnp.tile(weight.astype(jnp.float32), N)
    if r_pad != R:
        w_rows = jnp.pad(w_rows, (0, r_pad - R))
    w_rows = w_rows.reshape(r_pad, 1)

    nr = r_pad // tr
    nl = m_pad // tm

    kernel = functools.partial(
        _bce_logits_kernel,
        pos_weight=float(pos_weight),
        lane_tile=tm,
        valid_lanes=(M if m_pad != M else None),
    )

    partials = pl.pallas_call(
        kernel,
        out_shape=jax.ShapeDtypeStruct((nr * 8, tm), jnp.float32),
        grid_spec=pltpu.PrefetchScalarGridSpec(
            num_scalar_prefetch=0,
            grid=(nr, nl),                          # rows parallel, lanes reduce
            in_specs=[
                pl.BlockSpec((tr, tm), lambda i, j: (i, j)),
                pl.BlockSpec((tr, tm), lambda i, j: (i, j)),
                pl.BlockSpec((tr, 1), lambda i, j: (i, 0)),
            ],
            out_specs=pl.BlockSpec((8, tm), lambda i, j: (i, 0)),
            scratch_shapes=[pltpu.VMEM((tr, tm), jnp.float32)],
        ),
        compiler_params=pltpu.CompilerParams(
            dimension_semantics=("parallel", "arbitrary")),
    )(pred2, targ2, w_rows)

    # Tiny JAX epilogue: fold the lane-dense partials and normalize.
    return jnp.sum(partials) / jnp.float32(C * N * H * W)


def _reference(predict, target, weight, pos_weight):
    """Pure-JAX reference (independent log-sigmoid formulation)."""
    x = predict.astype(jnp.float32)
    y = target.astype(jnp.float32)
    pe = y * (pos_weight - 1.0) + 1.0
    log_sig = jax.nn.log_sigmoid(x)
    log_one_minus_sig = jax.nn.log_sigmoid(-x)
    loss = -(pe * y * log_sig + (1.0 - y) * log_one_minus_sig)  # (N,C,H,W)
    per_ch = jnp.mean(loss, axis=(0, 2, 3))                      # (C,)
    return jnp.sum(per_ch * weight) / x.shape[1]


if __name__ == "__main__":
    key = jax.random.PRNGKey(0)
    k1, k2 = jax.random.split(key)

    N, C, H, W = 2, 4, 16, 16
    predict = jax.random.normal(k1, (N, C, H, W), dtype=jnp.float32)
    target = jax.random.bernoulli(k2, p=0.3, shape=(N, C, H, W)).astype(jnp.float32)

    # Deterministic synthetic parameters (module's optional weight / pos_weight).
    weight = jnp.array([0.5, 1.0, 1.5, 2.0], dtype=jnp.float32)   # shape [C]
    pos_weight = 2.0                                              # scalar

    result = jax.block_until_ready(
        bce_with_logistic_loss(predict, target, weight, pos_weight))
    ref = jax.block_until_ready(_reference(predict, target, weight, pos_weight))

    assert result.dtype == jnp.float32
    assert jnp.allclose(result, ref, rtol=1e-5, atol=1e-5), (result, ref)

    print("KERNEL_OK")
</pallas_src>

<mosaic_0001>
module attributes {stable_mosaic.version = 11 : i64} {
  func.func @_bce_logits_kernel(%arg0: i32, %arg1: i32, %arg2: memref<8x256xf32, #tpu.memory_space<vmem>>, %arg3: memref<8x256xf32, #tpu.memory_space<vmem>>, %arg4: memref<8x1xf32, #tpu.memory_space<vmem>>, %arg5: memref<8x256xf32, #tpu.memory_space<vmem>>, %arg6: memref<8x256xf32, #tpu.memory_space<vmem>>) attributes {dimension_semantics = [#tpu.dimension_semantics<parallel>, #tpu.dimension_semantics<arbitrary>], iteration_bounds = array<i64: 1, 1>, scalar_prefetch = 0 : i64, scratch_operands = 1 : i64, tpu.core_type = #tpu.core_type<tc>, window_params = [{transform_indices = @transform_0, window_bounds = array<i64: 8, 256>}, {transform_indices = @transform_1, window_bounds = array<i64: 8, 256>}, {transform_indices = @transform_2, window_bounds = array<i64: 8, 1>}, {transform_indices = @transform_3, window_bounds = array<i64: 8, 256>}]} {
    %c0_i32 = arith.constant 0 : i32
    %0 = arith.cmpi eq, %arg1, %c0_i32 : i32
    %1 = arith.extui %0 : i1 to i32
    %c0_i32_0 = arith.constant 0 : i32
    %2 = arith.cmpi ne, %1, %c0_i32_0 : i32
    scf.if %2 {
      %cst_17 = arith.constant 0.000000e+00 : f32
      %34 = vector.broadcast %cst_17 : f32 to vector<8x256xf32>
      %c0_18 = arith.constant 0 : index
      %c0_19 = arith.constant 0 : index
      %35 = vector.load %arg6[%c0_18, %c0_19] : memref<8x256xf32, #tpu.memory_space<vmem>>, vector<8x256xf32>
      tpu.vector_store %arg6[%c0_18, %c0_19], %34 {strides = array<i32>} : memref<8x256xf32, #tpu.memory_space<vmem>>, vector<8x256xf32>,
    } else {
    }
    %c0 = arith.constant 0 : index
    %c0_1 = arith.constant 0 : index
    %3 = vector.load %arg2[%c0, %c0_1] : memref<8x256xf32, #tpu.memory_space<vmem>>, vector<8x256xf32>
    %c0_2 = arith.constant 0 : index
    %c0_3 = arith.constant 0 : index
    %4 = vector.load %arg3[%c0_2, %c0_3] : memref<8x256xf32, #tpu.memory_space<vmem>>, vector<8x256xf32>
    %cst = arith.constant 1.000000e+00 : f32
    %5 = vector.broadcast %cst : f32 to vector<8x256xf32>
    %6 = arith.mulf %5, %4 : vector<8x256xf32>
    %7 = arith.mulf %6, %4 : vector<8x256xf32>
    %cst_4 = arith.constant 1.000000e+00 : f32
    %8 = vector.broadcast %cst_4 : f32 to vector<8x256xf32>
    %9 = arith.addf %8, %7 : vector<8x256xf32>
    %10 = math.absf %3 : vector<8x256xf32>
    %cst_5 = arith.constant 0.000000e+00 : f32
    %11 = vector.broadcast %cst_5 : f32 to vector<8x256xf32>
    %12 = arith.subf %11, %10 : vector<8x256xf32>
    %13 = math.exp %12 : vector<8x256xf32>
    %14 = math.log1p %13 : vector<8x256xf32>
    %cst_6 = arith.constant 0.000000e+00 : f32
    %15 = vector.broadcast %cst_6 : f32 to vector<8x256xf32>
    %16 = arith.subf %15, %3 : vector<8x256xf32>
    %cst_7 = arith.constant 0.000000e+00 : f32
    %17 = vector.broadcast %cst_7 : f32 to vector<8x256xf32>
    %18 = arith.maximumf %16, %17 : vector<8x256xf32>
    %19 = arith.addf %14, %18 : vector<8x256xf32>
    %cst_8 = arith.constant 1.000000e+00 : f32
    %20 = vector.broadcast %cst_8 : f32 to vector<8x256xf32>
    %21 = arith.subf %20, %4 : vector<8x256xf32>
    %22 = arith.mulf %21, %3 : vector<8x256xf32>
    %23 = arith.mulf %9, %19 : vector<8x256xf32>
    %24 = arith.addf %22, %23 : vector<8x256xf32>
    %c0_9 = arith.constant 0 : index
    %c0_10 = arith.constant 0 : index
    %25 = vector.load %arg4[%c0_9, %c0_10] : memref<8x1xf32, #tpu.memory_space<vmem>>, vector<8x1xf32>
    %26 = vector.broadcast %25 : vector<8x1xf32> to vector<8x256xf32>
    %27 = arith.mulf %24, %26 : vector<8x256xf32>
    %c0_11 = arith.constant 0 : index
    %c0_12 = arith.constant 0 : index
    %28 = vector.load %arg6[%c0_11, %c0_12] : memref<8x256xf32, #tpu.memory_space<vmem>>, vector<8x256xf32>
    %29 = arith.addf %28, %27 : vector<8x256xf32>
    %c0_13 = arith.constant 0 : index
    %c0_14 = arith.constant 0 : index
    %30 = vector.load %arg6[%c0_13, %c0_14] : memref<8x256xf32, #tpu.memory_space<vmem>>, vector<8x256xf32>
    tpu.vector_store %arg6[%c0_13, %c0_14], %29 {strides = array<i32>} : memref<8x256xf32, #tpu.memory_space<vmem>>, vector<8x256xf32>,
    %c0_i32_15 = arith.constant 0 : i32
    %31 = arith.cmpi eq, %arg1, %c0_i32_15 : i32
    %32 = arith.extui %31 : i1 to i32
    %c0_i32_16 = arith.constant 0 : i32
    %33 = arith.cmpi ne, %32, %c0_i32_16 : i32
    scf.if %33 {
      %c0_17 = arith.constant 0 : index
      %c0_18 = arith.constant 0 : index
      %34 = vector.load %arg6[%c0_17, %c0_18] : memref<8x256xf32, #tpu.memory_space<vmem>>, vector<8x256xf32>
      %35 = vector.shape_cast %34 : vector<8x256xf32> to vector<1x8x256xf32>
      %cst_19 = arith.constant dense<0.000000e+00> : vector<8x256xf32>
      %36 = vector.multi_reduction <add>, %35, %cst_19 [0] : vector<1x8x256xf32> to vector<8x256xf32>
      %c0_20 = arith.constant 0 : index
      %c0_21 = arith.constant 0 : index
      %37 = vector.load %arg5[%c0_20, %c0_21] : memref<8x256xf32, #tpu.memory_space<vmem>>, vector<8x256xf32>
      tpu.vector_store %arg5[%c0_20, %c0_21], %36 {strides = array<i32>} : memref<8x256xf32, #tpu.memory_space<vmem>>, vector<8x256xf32>,
    } else {
    }
    return
  }
  func.func @transform_0(%arg0: i32, %arg1: i32) -> (i32, i32) {
    %c0_i32 = arith.constant 0 : i32
    return %arg0, %arg1 : i32, i32
  }
  func.func @transform_1(%arg0: i32, %arg1: i32) -> (i32, i32) {
    %c0_i32 = arith.constant 0 : i32
    return %arg0, %arg1 : i32, i32
  }
  func.func @transform_2(%arg0: i32, %arg1: i32) -> (i32, i32) {
    %c0_i32 = arith.constant 0 : i32
    %c0_i32_0 = arith.constant 0 : i32
    return %arg0, %c0_i32 : i32, i32
  }
  func.func @transform_3(%arg0: i32, %arg1: i32) -> (i32, i32) {
    %c0_i32 = arith.constant 0 : i32
    %c0_i32_0 = arith.constant 0 : i32
    return %arg0, %c0_i32 : i32, i32
  }
}

</mosaic_0001>

<bundles_post_ra>
// kernel: tpu_custom_call.1
= control target key start
LH: loop header
LB: loop body
LE: loop exit
PB: predicated region body
PF: predicated region fallthrough
CT: control target
= control target key end

     0   :  { %8 = vsyncpa [#allocation4], 0  ;;  %s247_s0 = inlined_call_operand.hbm [shape: f32[8,256], index: 0, kind: input, shape index: {}]   ;;  %s248_s1 = inlined_call_operand.hbm [shape: f32[8,256], index: 1, kind: input, shape index: {}]   ;;  %s249_s2 = inlined_call_operand.vmem [shape: f32[8,1], index: 2, kind: input, shape index: {}]   ;;  %s250_s3 = inlined_call_operand.hbm [shape: f32[8,256], index: 3, kind: output, shape index: {}]  }
   0x1   :  { %9 = vsyncpa [#allocation7], 0 }
   0x2   :  { %10 = vsyncpa [#allocation5], 0  ;;  %s211_s12 = smov [#allocation3]   ;;  %s212_s14 = smov [#allocation6]  }
   0x3   :  { %s17_s13 = sshll.u32 %s211_s12, 4  ;;  %s27_s15 = sshll.u32 %s212_s14, 4  ;;  %s18_s13 = int_to_ptr.vmem [resolvable:$true] %s17_s13  ;;  %s28_s15 = int_to_ptr.vmem [resolvable:$true] %s27_s15 }
   0x4   :  { %s153_s16 = scalar_lea.vmem %s18_s13, 256  ;;  %p158_p1 = scmp.lt.s32.totalorder %s18_s13, %s18_s13 }
   0x5   :  { %p154_p0 = scmp.ne.s32.totalorder %s18_s13, %s153_s16  ;;  %p159_p2 = scmp.lt.s32.totalorder %s153_s16, %s153_s16 }
   0x7   :  { %p160_p3 = por %p159_p2, %p158_p1 }
   0x9   :  { %p161_p4 = pnand %p160_p3, %p154_p0 }
   0xb   :  { %164 = shalt.err (!%p161_p4)
}
   0xc   :  { %20 = dma.hbm_to_vmem [thread:$0]  %s247_s0, 256, %s18_s13, [#allocation4]  }
   0xd   :  { %s173_s19 = scalar_lea.vmem %s28_s15, 256  ;;  %p178_p6 = scmp.lt.s32.totalorder %s28_s15, %s28_s15 }
   0xe   :  { %p174_p5 = scmp.ne.s32.totalorder %s28_s15, %s173_s19  ;;  %p179_p7 = scmp.lt.s32.totalorder %s173_s19, %s173_s19 }
  0x10   :  { %p180_p8 = por %p179_p7, %p178_p6 }
  0x12   :  { %p181_p9 = pnand %p180_p8, %p174_p5 }
  0x14   :  { %184 = shalt.err (!%p181_p9)
}
  0x15   :  { %30 = dma.hbm_to_vmem [thread:$0]  %s248_s1, 256, %s28_s15, [#allocation7]  }
  0x16   :  { %205 = dma.done.wait [#allocation4], 256  }
  0x17   :  { %206 = vsyncadd [#allocation4], 4294967040 }
  0x18   :  { %207 = dma.done.wait [#allocation7], 256  }
  0x19   :  { %208 = vsyncadd [#allocation7], 4294967040  ;;  %v213_v0 = vmov 0   ;;  %v93_v1 = vld [vmem:[%s249_s2] sm:$0xff]  ;;  %v46_v3 = vld [vmem:[#allocation3 + $0x8] sm:$0xff]  ;;  %s214_s0 = smov [#allocation8]  }
  0x1a   :  { %136 = vset.pattern.permute.xlu0 %v213_v0  ;;  %v45_v2 = vld [vmem:[#allocation3] sm:$0xff]  ;;  %v54_v5 = vand.u32 2147483647, %v46_v3  ;;  %v80_v23 = vsub.f32 0.0, %v46_v3  ;;  %v47_v24 = vld [vmem:[#allocation6] sm:$0xff]  ;;  %v48_v25 = vld [vmem:[#allocation6 + $0x8] sm:$0xff] }
  0x1b   :  { %96 = vperm.xlu0 %136, %v93_v1   ;;  %v53_v4 = vand.u32 2147483647, %v45_v2  ;;  %v79_v22 = vsub.f32 0.0, %v45_v2  ;;  %v49_v30 = vmul.f32 %v47_v24, %v47_v24  ;;  %v50_v31 = vmul.f32 %v48_v25, %v48_v25  ;;  %s122_s1 = sshll.u32 %s214_s0, 4  ;;  %s123_s1 = int_to_ptr.vmem [resolvable:$true] %s122_s1 }
  0x1c   :  { %v56_v7 = vsub.f32 0.0, %v54_v5  ;;  %v82_v33 = vmax.f32 %v80_v23, 0.0  ;;  %v85_v36 = vsub.f32 1.0, %v47_v24  ;;  %v86_v37 = vsub.f32 1.0, %v48_v25  ;;  %s185_s2 = scalar_lea.vmem %s123_s1, 256  ;;  %p190_p11 = scmp.lt.s32.totalorder %s123_s1, %s123_s1 }
  0x1d   :  { %v55_v6 = vsub.f32 0.0, %v53_v4  ;;  %v81_v32 = vmax.f32 %v79_v22, 0.0  ;;  %v51_v38 = vadd.f32 1.0, %v49_v30  ;;  %v52_v39 = vadd.f32 1.0, %v50_v31  ;;  %p186_p10 = scmp.ne.s32.totalorder %s123_s1, %s185_s2  ;;  %p191_p12 = scmp.lt.s32.totalorder %s185_s2, %s185_s2 }
  0x1e   :  { %v59_v9 = vmul.f32 1.442695, %v56_v7  ;;  %v87_v42 = vmul.f32 %v85_v36, %v45_v2  ;;  %v88_v43 = vmul.f32 %v86_v37, %v46_v3 }
  0x1f   :  { %v57_v8 = vmul.f32 1.442695, %v55_v6  ;;  %p192_p13 = por %p191_p12, %p190_p11 }
  0x21   :  { %137 = vpow2.f32 %v57_v8  ;;  %p193_p0 = pnand %p192_p13, %p186_p10 }
  0x22   :  { %139 = vpow2.f32 %v59_v9 }
  0x2e   :  { %v138_v10 = vpop.eup %137 }
  0x2f   :  { %v140_v11 = vpop.eup %139  ;;  %v61_v12 = vadd.f32 1.0, %v138_v10  ;;  %v64_v14 = vmul.f32 -0.5, %v138_v10  ;;  %v67_v20 = vand.u32 2147483647, %v138_v10 }
  0x30   :  { %v70_v13 = vadd.f32 1.0, %v140_v11  ;;  %v73_v15 = vmul.f32 -0.5, %v140_v11  ;;  %v76_v21 = vand.u32 2147483647, %v140_v11 }
  0x31   :  { %141 = vlog2.f32 %v61_v12  ;;  %v65_v17 = vadd.f32 1.0, %v64_v14  ;;  %vm68_vm0 = vcmp.lt.f32.partialorder %v67_v20, 0.0004427343 }
  0x32   :  { %143 = vlog2.f32 %v70_v13  ;;  %v74_v18 = vadd.f32 1.0, %v73_v15  ;;  %vm77_vm1 = vcmp.lt.f32.partialorder %v76_v21, 0.0004427343 }
  0x33   :  { %v66_v27 = vmul.f32 %v138_v10, %v65_v17 }
  0x34   :  { %v75_v29 = vmul.f32 %v140_v11, %v74_v18 }
  0x3e   :  { %v142_v16 = vpop.eup %141 }
  0x3f   :  { %v144_v19 = vpop.eup %143  ;;  %v63_v26 = vmul.f32 0.6931472, %v142_v16 }
  0x40   :  { %v72_v28 = vmul.f32 0.6931472, %v144_v19 }
  0x41   :  { %v69_v34 = vsel %vm68_vm0, %v66_v27, %v63_v26 }
  0x42   :  { %v78_v35 = vsel %vm77_vm1, %v75_v29, %v72_v28  ;;  %v83_v40 = vadd.f32 %v81_v32, %v69_v34 }
  0x43   :  { %v84_v41 = vadd.f32 %v82_v33, %v78_v35 }
  0x44   :  { %v89_v44 = vmul.f32 %v83_v40, %v51_v38 }
  0x45   :  { %v90_v45 = vmul.f32 %v84_v41, %v52_v39 }
  0x46   :  { %v91_v46 = vadd.f32 %v89_v44, %v87_v42 }
  0x47   :  { %v92_v47 = vadd.f32 %v90_v45, %v88_v43 }
  0x96   :  { %v97_v48 = vpop.permute.xlu0 %96 }
  0x97   :  { %v99_v49 = vmul.f32 %v97_v48, %v91_v46  ;;  %v100_v50 = vmul.f32 %v97_v48, %v92_v47 }
  0x99   :  { %114 = vst [vmem:[#allocation8] sm:$0xff] %v99_v49  ;;  %115 = vst [vmem:[#allocation8 + $0x8] sm:$0xff] %v100_v50 }
  0x9a   :  { %196 = shalt.err (!%p193_p0)
}
  0x9b   :  { %125 = dma.vmem_to_hbm [thread:$0]  %s123_s1, 256, %s250_s3, [#allocation5]  }
  0x9c   :  { %209 = dma.done.wait [#allocation5], 256  }
  0x9d   :  { %210 = vsyncadd [#allocation5], 4294967040 }
  0x9e   :  { %129 = vsyncpa [#allocation4], 1 }
  0x9f   :  { %130 = vsyncpa [#allocation7], 1 }
  0xa0   :  { %131 = vsyncpa [#allocation5], 1 }

</bundles_post_ra>
